<compile_context>
chip_gen: v7x
topology: tpu7x:2x2x1
jax: 0.10.0
libtpu: 0.0.40
codegen_flags: <defaults>
</compile_context>

<pallas_src>
import jax
import jax.numpy as jnp
from jax.experimental import pallas as pl
from jax.experimental.pallas import tpu as pltpu

# True model sizes.
IN_F = 2
HID_F = 4
OUT_F = 1

# Padded hidden width (sublane multiple) and the row carrying the constant 1.
P = 8
ONE_ROW = P - 1

LANE = 128            # batch (lane dim) padded to a multiple of this
MAX_TB = 32768        # max batch-tile (lane) width per grid step, multiple of 128


def _round_up(n, m):
    return ((n + m - 1) // m) * m


def mlp_kernel(xT_ref, w1_ref, w2_ref, w3_ref, o_ref):
    """Whole 3-layer MLP on one batch tile, transposed layout.

    xT tile: (IN_F+1, tb) -- rows 0..1 = features, row 2 = 1.0 (bias row).
    w1: (8, 3)  rows 0..3 = [w1.T | b1], row 7 = [0,0,1]  (propagates the 1).
    w2: (8, 8)  rows 0..3 = [w2.T | 0 0 0 b2], row 7 = e7.
    w3: (1, 8)  [w3.T | 0 0 0 b3].
    Output tile: (1, tb), lane-dense.
    """
    h = jnp.maximum(
        jnp.dot(w1_ref[...], xT_ref[...], preferred_element_type=jnp.float32), 0.0)
    h = jnp.maximum(
        jnp.dot(w2_ref[...], h, preferred_element_type=jnp.float32), 0.0)
    out = jnp.dot(w3_ref[...], h, preferred_element_type=jnp.float32)
    o_ref[...] = out.astype(o_ref.dtype)


def pack_params(params):
    """Transpose + bias-fold + pad parameters ONCE (out of the per-call path)."""
    (w1, b1), (w2, b2), (w3, b3) = params

    w1p = jnp.zeros((P, IN_F + 1), jnp.float32)
    w1p = w1p.at[:HID_F, :IN_F].set(w1.T)
    w1p = w1p.at[:HID_F, IN_F].set(b1)
    w1p = w1p.at[ONE_ROW, IN_F].set(1.0)        # keep the constant-1 row alive

    w2p = jnp.zeros((P, P), jnp.float32)
    w2p = w2p.at[:HID_F, :HID_F].set(w2.T)
    w2p = w2p.at[:HID_F, ONE_ROW].set(b2)
    w2p = w2p.at[ONE_ROW, ONE_ROW].set(1.0)

    w3p = jnp.zeros((OUT_F, P), jnp.float32)
    w3p = w3p.at[:OUT_F, :HID_F].set(w3.T)
    w3p = w3p.at[:OUT_F, ONE_ROW].set(b3)
    return w1p, w2p, w3p


def mynet_forward(x, packed_params, *, max_tb=MAX_TB):
    """x: [batch, 2] float32, packed_params from pack_params().

    Returns [batch, 1] float32.
    """
    w1p, w2p, w3p = packed_params
    batch = x.shape[0]

    # Batch on lanes: pad only to a multiple of 128 (no round-up-to-tile).
    b_pad = _round_up(batch, LANE)
    tb = min(max_tb, b_pad)
    grid = (pl.cdiv(b_pad, tb),)

    # (3, b_pad) slab: [x.T ; ones].  Garbage-free, cheap (~1.5x input bytes).
    xt = jnp.concatenate(
        [x.T.astype(jnp.float32), jnp.ones((1, batch), jnp.float32)], axis=0)
    xT = jnp.pad(xt, ((0, 0), (0, b_pad - batch)))

    bytes_accessed = 4 * ((IN_F + 1) * b_pad            # xT read
                          + w1p.size + w2p.size + w3p.size
                          + OUT_F * b_pad)               # output write
    flops = 2 * b_pad * (P * (IN_F + 1) + P * P + OUT_F * P)

    out = pl.pallas_call(
        mlp_kernel,
        out_shape=jax.ShapeDtypeStruct((OUT_F, b_pad), jnp.float32),
        grid=grid,
        in_specs=[
            pl.BlockSpec((IN_F + 1, tb), lambda i: (0, i)),   # xT: tiled over batch
            pl.BlockSpec((P, IN_F + 1), lambda i: (0, 0)),    # w1: resident
            pl.BlockSpec((P, P), lambda i: (0, 0)),           # w2: resident
            pl.BlockSpec((OUT_F, P), lambda i: (0, 0)),       # w3: resident
        ],
        out_specs=pl.BlockSpec((OUT_F, tb), lambda i: (0, i)),
        compiler_params=pltpu.CompilerParams(
            dimension_semantics=("parallel",),   # v7x: split batch over the 2 TCs
        ),
        cost_estimate=pl.CostEstimate(
            flops=flops, transcendentals=0, bytes_accessed=bytes_accessed),
    )(xT, w1p, w2p, w3p)

    # (1, b_pad) -> (batch, 1); padded lane columns are dropped here.
    return out[:OUT_F, :batch].T


def init_params(key):
    """Deterministic init mimicking nn.Linear default: U(-1/sqrt(fan_in), +...)."""
    def linear_init(k, fan_in, fan_out):
        kw, kb = jax.random.split(k)
        bound = 1.0 / jnp.sqrt(float(fan_in))
        w = jax.random.uniform(kw, (fan_in, fan_out), jnp.float32, -bound, bound)
        b = jax.random.uniform(kb, (fan_out,), jnp.float32, -bound, bound)
        return w, b

    k1, k2, k3 = jax.random.split(key, 3)
    return (
        linear_init(k1, IN_F, HID_F),
        linear_init(k2, HID_F, HID_F),
        linear_init(k3, HID_F, OUT_F),
    )


def reference_forward(x, params):
    """Pure-JAX reference of the same MLP (for correctness check)."""
    (w1, b1), (w2, b2), (w3, b3) = params
    h1 = jnp.maximum(x @ w1 + b1, 0.0)
    h2 = jnp.maximum(h1 @ w2 + b2, 0.0)
    return h2 @ w3 + b3


if __name__ == "__main__":
    key = jax.random.PRNGKey(0)
    pkey, xkey = jax.random.split(key)

    params = init_params(pkey)
    packed = pack_params(params)            # hoisted: packed/padded once

    fwd = jax.jit(mynet_forward)

    # Like x = torch.Tensor([[0.5, 0.1]]) in the original, plus one random
    # row so batch=2 exercises a slightly less trivial case.
    x = jnp.concatenate(
        [jnp.array([[0.5, 0.1]], jnp.float32),
         jax.random.uniform(xkey, (1, IN_F), jnp.float32)],
        axis=0,
    )

    out = jax.block_until_ready(fwd(x, packed))

    ref = reference_forward(x, params)
    assert out.shape == (2, OUT_F)
    assert jnp.allclose(out, ref, atol=1e-5, rtol=1e-5)

    # TODO(synk): train_model (Adam + MSELoss backward) is training-only and
    # intentionally not implemented; only the forward/test path is kernelized.
    print("KERNEL_OK")
</pallas_src>

<mosaic_0001>
module attributes {stable_mosaic.version = 11 : i64} {
  func.func @mlp_kernel(%arg0: i32, %arg1: memref<3x128xf32, #tpu.memory_space<vmem>>, %arg2: memref<8x3xf32, #tpu.memory_space<vmem>>, %arg3: memref<8x8xf32, #tpu.memory_space<vmem>>, %arg4: memref<1x8xf32, #tpu.memory_space<vmem>>, %arg5: memref<1x128xf32, #tpu.memory_space<vmem>>) attributes {dimension_semantics = [#tpu.dimension_semantics<parallel>], iteration_bounds = array<i64: 1>, scalar_prefetch = 0 : i64, scratch_operands = 0 : i64, tpu.core_type = #tpu.core_type<tc>, window_params = [{transform_indices = @transform_0, window_bounds = array<i64: 3, 128>}, {pipeline_mode = #tpu.pipeline_mode<synchronous>, transform_indices = @transform_1, window_bounds = array<i64: 8, 3>}, {pipeline_mode = #tpu.pipeline_mode<synchronous>, transform_indices = @transform_2, window_bounds = array<i64: 8, 8>}, {pipeline_mode = #tpu.pipeline_mode<synchronous>, transform_indices = @transform_3, window_bounds = array<i64: 1, 8>}, {transform_indices = @transform_4, window_bounds = array<i64: 1, 128>}]} {
    %c0 = arith.constant 0 : index
    %c0_0 = arith.constant 0 : index
    %0 = vector.load %arg2[%c0, %c0_0] : memref<8x3xf32, #tpu.memory_space<vmem>>, vector<8x3xf32>
    %c0_1 = arith.constant 0 : index
    %c0_2 = arith.constant 0 : index
    %1 = vector.load %arg1[%c0_1, %c0_2] : memref<3x128xf32, #tpu.memory_space<vmem>>, vector<3x128xf32>
    %cst = arith.constant dense<0.000000e+00> : vector<8x128xf32>
    %2 = tpu.matmul %0, %1, %cst {dimension_numbers = #tpu.dot_dimension_numbers<[1], [0], [0], [1], [0, 0, 1, 1], [], []>} : vector<8x3xf32>, vector<3x128xf32>, vector<8x128xf32> -> vector<8x128xf32>
    %cst_3 = arith.constant 0.000000e+00 : f32
    %3 = vector.broadcast %cst_3 : f32 to vector<8x128xf32>
    %4 = arith.maximumf %2, %3 : vector<8x128xf32>
    %c0_4 = arith.constant 0 : index
    %c0_5 = arith.constant 0 : index
    %5 = vector.load %arg3[%c0_4, %c0_5] : memref<8x8xf32, #tpu.memory_space<vmem>>, vector<8x8xf32>
    %cst_6 = arith.constant dense<0.000000e+00> : vector<8x128xf32>
    %6 = tpu.matmul %5, %4, %cst_6 {dimension_numbers = #tpu.dot_dimension_numbers<[1], [0], [0], [1], [0, 0, 1, 1], [], []>} : vector<8x8xf32>, vector<8x128xf32>, vector<8x128xf32> -> vector<8x128xf32>
    %cst_7 = arith.constant 0.000000e+00 : f32
    %7 = vector.broadcast %cst_7 : f32 to vector<8x128xf32>
    %8 = arith.maximumf %6, %7 : vector<8x128xf32>
    %c0_8 = arith.constant 0 : index
    %c0_9 = arith.constant 0 : index
    %9 = vector.load %arg4[%c0_8, %c0_9] : memref<1x8xf32, #tpu.memory_space<vmem>>, vector<1x8xf32>
    %cst_10 = arith.constant dense<0.000000e+00> : vector<1x128xf32>
    %10 = tpu.matmul %9, %8, %cst_10 {dimension_numbers = #tpu.dot_dimension_numbers<[1], [0], [0], [1], [0, 0, 1, 1], [], []>} : vector<1x8xf32>, vector<8x128xf32>, vector<1x128xf32> -> vector<1x128xf32>
    %c0_11 = arith.constant 0 : index
    %c0_12 = arith.constant 0 : index
    %11 = vector.load %arg5[%c0_11, %c0_12] : memref<1x128xf32, #tpu.memory_space<vmem>>, vector<1x128xf32>
    tpu.vector_store %arg5[%c0_11, %c0_12], %10 {strides = array<i32>} : memref<1x128xf32, #tpu.memory_space<vmem>>, vector<1x128xf32>,
    return
  }
  func.func @transform_0(%arg0: i32) -> (i32, i32) {
    %c0_i32 = arith.constant 0 : i32
    %c0_i32_0 = arith.constant 0 : i32
    return %c0_i32, %arg0 : i32, i32
  }
  func.func @transform_1(%arg0: i32) -> (i32, i32) {
    %c0_i32 = arith.constant 0 : i32
    %c0_i32_0 = arith.constant 0 : i32
    %c0_i32_1 = arith.constant 0 : i32
    return %c0_i32, %c0_i32_0 : i32, i32
  }
  func.func @transform_2(%arg0: i32) -> (i32, i32) {
    %c0_i32 = arith.constant 0 : i32
    %c0_i32_0 = arith.constant 0 : i32
    %c0_i32_1 = arith.constant 0 : i32
    return %c0_i32, %c0_i32_0 : i32, i32
  }
  func.func @transform_3(%arg0: i32) -> (i32, i32) {
    %c0_i32 = arith.constant 0 : i32
    %c0_i32_0 = arith.constant 0 : i32
    %c0_i32_1 = arith.constant 0 : i32
    return %c0_i32, %c0_i32_0 : i32, i32
  }
  func.func @transform_4(%arg0: i32) -> (i32, i32) {
    %c0_i32 = arith.constant 0 : i32
    %c0_i32_0 = arith.constant 0 : i32
    return %c0_i32, %arg0 : i32, i32
  }
}

</mosaic_0001>

<bundles_post_ra>
// kernel: mynet_forward.1
= control target key start
LH: loop header
LB: loop body
LE: loop exit
PB: predicated region body
PF: predicated region fallthrough
CT: control target
= control target key end

     0   :  { %vm23_vm0 = vcmask 1042432   ;;  %vm19_vm1 = vcmask 23552   ;;  %v280_v0 = vmov 0.0   ;;  %vm281_vm2 = vmmov 0   ;;  %s322_s0 = inlined_call_operand.vmem [shape: f32[3,128], index: 0, kind: input, shape index: {}]   ;;  %s323_s1 = inlined_call_operand.vmem [shape: f32[8,3], index: 1, kind: input, shape index: {}]   ;;  %s324_s2 = inlined_call_operand.vmem [shape: f32[8,8], index: 2, kind: input, shape index: {}]   ;;  %s325_s3 = inlined_call_operand.vmem [shape: f32[1,8], index: 3, kind: input, shape index: {}]   ;;  %s326_s4 = inlined_call_operand.vmem [shape: f32[1,128], index: 4, kind: output, shape index: {}]  }
   0x1   :  { %263 = vmatprep.subr.mxu0 %v280_v0  ;;  %v18_v1 = vld [vmem:[%s322_s0] sm:$0x7]  ;;  %265 = vmatprep.mubr.msk.f32.mxu0 %vm281_vm2, %v280_v0  ;;  %vm99_vm3 = vcmask 64512  }
   0x2   :  { %v17_v2 = vld [vmem:[%s323_s1] sm:$0xff]  ;;  %264 = vmatpush3.msk.msra.mxu0 %vm23_vm0, %v18_v1  ;;  %268 = vmatprep.subr.mxu1 %v280_v0 }
   0x3   :  { %266 = vmatmul.mubr.msk.f32.vlgmr.msra.gmra.mrb[0].mxu0 %vm19_vm1, %v17_v2  ;;  %270 = vmatprep.mubr.msk.f32.mxu1 %vm281_vm2, %v280_v0  ;;  %v98_v6 = vld [vmem:[%s324_s2] sm:$0xff] }
   0x4   :  { %273 = vmatprep.subr.mxu0 %v280_v0  ;;  %275 = vmatprep.mubr.msk.f32.mxu0 %vm281_vm2, %v280_v0  ;;  %v174_v10 = vld [vmem:[%s325_s3] sm:$0x1] }
  0xd6   :  { %v93_v3 = vpop.f32.mrb[0].mxu0 }
  0xd7   :  { %v97_v4 = vmax.f32 %v93_v3, 0.0  ;;  %v267_v5 = vpop.f32.mrb[1].mxu0 }
  0xd9   :  { %269 = vmatpush3.msra.mxu1 %v97_v4 }
  0xda   :  { %271 = vmatmul.mubr.msk.f32.vlgmr.msra.gmra.mrb[0].mxu1 %vm99_vm3, %v98_v6 }
 0x1ad   :  { %v169_v7 = vpop.f32.mrb[0].mxu1 }
 0x1ae   :  { %v173_v8 = vmax.f32 %v169_v7, 0.0  ;;  %v272_v9 = vpop.f32.mrb[1].mxu1 }
 0x1b0   :  { %274 = vmatpush3.msra.mxu0 %v173_v8 }
 0x1b1   :  { %276 = vmatmul.mubr.msk.f32.vlgmr.msra.gmra.mrb[2].mxu0 %vm99_vm3, %v174_v10 }
 0x284   :  { %v244_v11 = vpop.f32.mrb[2].mxu0 }
 0x285   :  { %248 = vst [vmem:[%s326_s4] sm:$0x1] %v244_v11  ;;  %v277_v12 = vpop.f32.mrb[3].mxu0 }

</bundles_post_ra>
